<compile_context>
chip_gen: v5e
topology: v5e:2x2
jax: 0.10.0
libtpu: 0.0.40
codegen_flags: <defaults>
</compile_context>

<pallas_src>
import functools

import jax
import jax.numpy as jnp
from jax import lax
from jax.experimental import pallas as pl
from jax.experimental.pallas import tpu as pltpu


_LANE = 128                       # lane granule (last block dim)
_SUBLANE = 8                      # sublane granule (second-to-last block dim)
_LANE_TILE_TARGET = 1024          # preferred lanes per block (512-2048 sweet spot)
_ROW_TILE_TARGET = 1024           # preferred sublane rows per block
_MAX_BLOCK_BYTES = 2 * 1024 * 1024  # per x-block cap; (in+out)*2buf ~ 8 MiB


def _pick_tile(total, granule, bytes_per_unit, target, max_block_bytes):
    """Largest tile t <= target with t % granule == 0, total % t == 0 and
    t * bytes_per_unit <= max_block_bytes.  Falls back to the full extent when
    `total` is not a multiple of the granule (allowed: block dim == array dim)."""
    if total % granule != 0:
        return total
    hi = min(total, max(target, granule))
    best = granule
    t = granule
    while t <= hi:
        if total % t == 0 and t * bytes_per_unit <= max_block_bytes:
            best = t
        t += granule
    return best


# ---------------------------------------------------------------------------
# channels_first kernel: x block is (1, C, HW_T); reduce over C (sublane axis)
# ---------------------------------------------------------------------------
def _ln_channels_first_kernel(x_ref, w_ref, b_ref, o_ref, *, eps, inv_c):
    x = x_ref[0].astype(jnp.float32)                   # (C, HW_T)
    # One-pass stats (f32 accumulation), biased variance as in torch.
    s1 = jnp.sum(x, axis=0, keepdims=True)             # (1, HW_T)
    s2 = jnp.sum(x * x, axis=0, keepdims=True)         # (1, HW_T)
    mean = s1 * inv_c
    var = jnp.maximum(s2 * inv_c - mean * mean, 0.0)
    inv = lax.rsqrt(var + eps)                         # EUP
    y = (x - mean) * inv                               # (C, HW_T)
    o_ref[0] = (y * w_ref[...] + b_ref[...]).astype(o_ref.dtype)


def layer_norm_channels_first(x, weight, bias, eps=1e-6):
    """x: (B, C, H, W); weight, bias: (C,). Returns (B, C, H, W)."""
    B, C, H, W = x.shape
    HW = H * W
    x3 = x.reshape(B, C, HW)                 # free reshape of NCHW, no transpose
    w2 = weight.reshape(C, 1).astype(jnp.float32)
    b2 = bias.reshape(C, 1).astype(jnp.float32)

    bytes_per_lane = C * x.dtype.itemsize    # bytes per lane-column of an x block
    hw_t = _pick_tile(HW, _LANE, bytes_per_lane, _LANE_TILE_TARGET, _MAX_BLOCK_BYTES)
    grid = (B, HW // hw_t)

    out = pl.pallas_call(
        functools.partial(_ln_channels_first_kernel, eps=eps, inv_c=1.0 / C),
        out_shape=jax.ShapeDtypeStruct((B, C, HW), x.dtype),
        grid_spec=pltpu.PrefetchScalarGridSpec(
            num_scalar_prefetch=0,
            grid=grid,
            in_specs=[
                pl.BlockSpec((1, C, hw_t), lambda b, t: (b, 0, t)),
                pl.BlockSpec((C, 1), lambda b, t: (0, 0)),
                pl.BlockSpec((C, 1), lambda b, t: (0, 0)),
            ],
            out_specs=pl.BlockSpec((1, C, hw_t), lambda b, t: (b, 0, t)),
        ),
        compiler_params=pltpu.CompilerParams(
            dimension_semantics=("parallel", "parallel")),
    )(x3, w2, b2)
    return out.reshape(B, C, H, W)


# ---------------------------------------------------------------------------
# channels_last kernel: x block is (1, N_T, C); reduce over C (lane axis)
# ---------------------------------------------------------------------------
def _ln_channels_last_kernel(x_ref, w_ref, b_ref, o_ref, *, eps, inv_c):
    x = x_ref[0].astype(jnp.float32)                   # (N_T, C)
    s1 = jnp.sum(x, axis=1, keepdims=True)             # (N_T, 1)  cross-lane (XLU)
    s2 = jnp.sum(x * x, axis=1, keepdims=True)         # (N_T, 1)
    mean = s1 * inv_c
    var = jnp.maximum(s2 * inv_c - mean * mean, 0.0)
    inv = lax.rsqrt(var + eps)
    o_ref[0] = ((x - mean) * inv * w_ref[...] + b_ref[...]).astype(o_ref.dtype)


def layer_norm_channels_last(x, weight, bias, eps=1e-6):
    """x: (B, H, W, C); weight, bias: (C,). Returns (B, H, W, C)."""
    B, H, W, C = x.shape
    N = H * W
    x3 = x.reshape(B, N, C)                  # free reshape, native layout kept
    w2 = weight.reshape(1, C).astype(jnp.float32)
    b2 = bias.reshape(1, C).astype(jnp.float32)

    bytes_per_row = C * x.dtype.itemsize     # bytes per sublane-row of an x block
    n_t = _pick_tile(N, _SUBLANE, bytes_per_row, _ROW_TILE_TARGET, _MAX_BLOCK_BYTES)
    grid = (B, N // n_t)

    out = pl.pallas_call(
        functools.partial(_ln_channels_last_kernel, eps=eps, inv_c=1.0 / C),
        out_shape=jax.ShapeDtypeStruct((B, N, C), x.dtype),
        grid_spec=pltpu.PrefetchScalarGridSpec(
            num_scalar_prefetch=0,
            grid=grid,
            in_specs=[
                pl.BlockSpec((1, n_t, C), lambda b, t: (b, t, 0)),
                pl.BlockSpec((1, C), lambda b, t: (0, 0)),
                pl.BlockSpec((1, C), lambda b, t: (0, 0)),
            ],
            out_specs=pl.BlockSpec((1, n_t, C), lambda b, t: (b, t, 0)),
        ),
        compiler_params=pltpu.CompilerParams(
            dimension_semantics=("parallel", "parallel")),
    )(x3, w2, b2)
    return out.reshape(B, H, W, C)


# ---------------------------------------------------------------------------
# Pure-JAX references (mirror the PyTorch forward exactly)
# ---------------------------------------------------------------------------
def _ref_channels_first(x, w, b, eps=1e-6):
    u = x.mean(axis=1, keepdims=True)
    s = jnp.mean((x - u) ** 2, axis=1, keepdims=True)
    xn = (x - u) / jnp.sqrt(s + eps)
    return w[None, :, None, None] * xn + b[None, :, None, None]


def _ref_channels_last(x, w, b, eps=1e-6):
    u = x.mean(axis=-1, keepdims=True)
    s = jnp.mean((x - u) ** 2, axis=-1, keepdims=True)
    xn = (x - u) / jnp.sqrt(s + eps)
    return xn * w + b


if __name__ == "__main__":
    key = jax.random.PRNGKey(0)
    ks = jax.random.split(key, 12)
    eps = 1e-6

    # ---- channels_first: (B, C, H, W), HW = 256 -> lane-dense 128/256 tiles ----
    B, C, H, W = 2, 32, 16, 16
    x_cf = jax.random.normal(ks[0], (B, C, H, W), dtype=jnp.float32)
    w_cf = 1.0 + 0.1 * jax.random.normal(ks[1], (C,), dtype=jnp.float32)
    b_cf = 0.1 * jax.random.normal(ks[2], (C,), dtype=jnp.float32)

    out_cf = jax.block_until_ready(layer_norm_channels_first(x_cf, w_cf, b_cf, eps))
    ref_cf = _ref_channels_first(x_cf, w_cf, b_cf, eps)
    assert out_cf.shape == (B, C, H, W)
    assert jnp.allclose(out_cf, ref_cf, atol=1e-5, rtol=1e-5)

    # ---- channels_last: (B, H, W, C) ----
    B2, H2, W2, C2 = 2, 8, 8, 32
    x_cl = jax.random.normal(ks[3], (B2, H2, W2, C2), dtype=jnp.float32)
    w_cl = 1.0 + 0.1 * jax.random.normal(ks[4], (C2,), dtype=jnp.float32)
    b_cl = 0.1 * jax.random.normal(ks[5], (C2,), dtype=jnp.float32)

    out_cl = jax.block_until_ready(layer_norm_channels_last(x_cl, w_cl, b_cl, eps))
    ref_cl = _ref_channels_last(x_cl, w_cl, b_cl, eps)
    assert out_cl.shape == (B2, H2, W2, C2)
    assert jnp.allclose(out_cl, ref_cl, atol=1e-5, rtol=1e-5)

    # ---- odd shapes (HW / N not multiples of the hardware granule) ----
    x_cf2 = jax.random.normal(ks[6], (2, 40, 7, 7), dtype=jnp.float32)
    w_cf2 = 1.0 + 0.1 * jax.random.normal(ks[7], (40,), dtype=jnp.float32)
    b_cf2 = 0.1 * jax.random.normal(ks[8], (40,), dtype=jnp.float32)
    out_cf2 = jax.block_until_ready(layer_norm_channels_first(x_cf2, w_cf2, b_cf2, eps))
    assert jnp.allclose(out_cf2, _ref_channels_first(x_cf2, w_cf2, b_cf2, eps),
                        atol=1e-5, rtol=1e-5)

    x_cl2 = jax.random.normal(ks[9], (2, 5, 5, 24), dtype=jnp.float32)
    w_cl2 = 1.0 + 0.1 * jax.random.normal(ks[10], (24,), dtype=jnp.float32)
    b_cl2 = 0.1 * jax.random.normal(ks[11], (24,), dtype=jnp.float32)
    out_cl2 = jax.block_until_ready(layer_norm_channels_last(x_cl2, w_cl2, b_cl2, eps))
    assert jnp.allclose(out_cl2, _ref_channels_last(x_cl2, w_cl2, b_cl2, eps),
                        atol=1e-5, rtol=1e-5)

    print("KERNEL_OK")
</pallas_src>

<mosaic_0001>
module attributes {stable_mosaic.version = 11 : i64} {
  func.func @_ln_channels_first_kernel(%arg0: i32, %arg1: i32, %arg2: memref<1x32x256xf32, #tpu.memory_space<vmem>>, %arg3: memref<32x1xf32, #tpu.memory_space<vmem>>, %arg4: memref<32x1xf32, #tpu.memory_space<vmem>>, %arg5: memref<1x32x256xf32, #tpu.memory_space<vmem>>) attributes {dimension_semantics = [#tpu.dimension_semantics<parallel>, #tpu.dimension_semantics<parallel>], iteration_bounds = array<i64: 2, 1>, scalar_prefetch = 0 : i64, scratch_operands = 0 : i64, tpu.core_type = #tpu.core_type<tc>, window_params = [{transform_indices = @transform_0, window_bounds = array<i64: 1, 32, 256>}, {pipeline_mode = #tpu.pipeline_mode<synchronous>, transform_indices = @transform_1, window_bounds = array<i64: 32, 1>}, {pipeline_mode = #tpu.pipeline_mode<synchronous>, transform_indices = @transform_2, window_bounds = array<i64: 32, 1>}, {transform_indices = @transform_3, window_bounds = array<i64: 1, 32, 256>}]} {
    %c0 = arith.constant 0 : index
    %c0_0 = arith.constant 0 : index
    %c0_1 = arith.constant 0 : index
    %0 = vector.load %arg2[%c0, %c0_0, %c0_1] : memref<1x32x256xf32, #tpu.memory_space<vmem>>, vector<1x32x256xf32>
    %1 = vector.shape_cast %0 : vector<1x32x256xf32> to vector<32x256xf32>
    %cst = arith.constant dense<0.000000e+00> : vector<256xf32>
    %2 = vector.multi_reduction <add>, %1, %cst [0] : vector<32x256xf32> to vector<256xf32>
    %3 = vector.shape_cast %2 : vector<256xf32> to vector<1x256xf32>
    %4 = arith.mulf %1, %1 : vector<32x256xf32>
    %cst_2 = arith.constant dense<0.000000e+00> : vector<256xf32>
    %5 = vector.multi_reduction <add>, %4, %cst_2 [0] : vector<32x256xf32> to vector<256xf32>
    %6 = vector.shape_cast %5 : vector<256xf32> to vector<1x256xf32>
    %cst_3 = arith.constant 3.125000e-02 : f32
    %7 = vector.broadcast %cst_3 : f32 to vector<1x256xf32>
    %8 = arith.mulf %3, %7 : vector<1x256xf32>
    %cst_4 = arith.constant 3.125000e-02 : f32
    %9 = vector.broadcast %cst_4 : f32 to vector<1x256xf32>
    %10 = arith.mulf %6, %9 : vector<1x256xf32>
    %11 = arith.mulf %8, %8 : vector<1x256xf32>
    %12 = arith.subf %10, %11 : vector<1x256xf32>
    %cst_5 = arith.constant 0.000000e+00 : f32
    %13 = vector.broadcast %cst_5 : f32 to vector<1x256xf32>
    %14 = arith.maximumf %12, %13 : vector<1x256xf32>
    %cst_6 = arith.constant 9.99999997E-7 : f32
    %15 = vector.broadcast %cst_6 : f32 to vector<1x256xf32>
    %16 = arith.addf %14, %15 : vector<1x256xf32>
    %17 = math.rsqrt %16 : vector<1x256xf32>
    %18 = vector.broadcast %8 : vector<1x256xf32> to vector<32x256xf32>
    %19 = arith.subf %1, %18 : vector<32x256xf32>
    %20 = vector.broadcast %17 : vector<1x256xf32> to vector<32x256xf32>
    %21 = arith.mulf %19, %20 : vector<32x256xf32>
    %c0_7 = arith.constant 0 : index
    %c0_8 = arith.constant 0 : index
    %22 = vector.load %arg3[%c0_7, %c0_8] : memref<32x1xf32, #tpu.memory_space<vmem>>, vector<32x1xf32>
    %23 = vector.broadcast %22 : vector<32x1xf32> to vector<32x256xf32>
    %24 = arith.mulf %21, %23 : vector<32x256xf32>
    %c0_9 = arith.constant 0 : index
    %c0_10 = arith.constant 0 : index
    %25 = vector.load %arg4[%c0_9, %c0_10] : memref<32x1xf32, #tpu.memory_space<vmem>>, vector<32x1xf32>
    %26 = vector.broadcast %25 : vector<32x1xf32> to vector<32x256xf32>
    %27 = arith.addf %24, %26 : vector<32x256xf32>
    %c0_11 = arith.constant 0 : index
    %c0_12 = arith.constant 0 : index
    %c0_13 = arith.constant 0 : index
    %28 = vector.load %arg5[%c0_11, %c0_12, %c0_13] : memref<1x32x256xf32, #tpu.memory_space<vmem>>, vector<1x32x256xf32>
    %29 = vector.shape_cast %28 : vector<1x32x256xf32> to vector<32x256xf32>
    %30 = vector.shape_cast %27 : vector<32x256xf32> to vector<1x32x256xf32>
    tpu.vector_store %arg5[%c0_11, %c0_12, %c0_13], %30 {strides = array<i32>} : memref<1x32x256xf32, #tpu.memory_space<vmem>>, vector<1x32x256xf32>,
    return
  }
  func.func @transform_0(%arg0: i32, %arg1: i32) -> (i32, i32, i32) {
    %c0_i32 = arith.constant 0 : i32
    %c0_i32_0 = arith.constant 0 : i32
    return %arg0, %c0_i32, %arg1 : i32, i32, i32
  }
  func.func @transform_1(%arg0: i32, %arg1: i32) -> (i32, i32) {
    %c0_i32 = arith.constant 0 : i32
    %c0_i32_0 = arith.constant 0 : i32
    %c0_i32_1 = arith.constant 0 : i32
    return %c0_i32, %c0_i32_0 : i32, i32
  }
  func.func @transform_2(%arg0: i32, %arg1: i32) -> (i32, i32) {
    %c0_i32 = arith.constant 0 : i32
    %c0_i32_0 = arith.constant 0 : i32
    %c0_i32_1 = arith.constant 0 : i32
    return %c0_i32, %c0_i32_0 : i32, i32
  }
  func.func @transform_3(%arg0: i32, %arg1: i32) -> (i32, i32, i32) {
    %c0_i32 = arith.constant 0 : i32
    %c0_i32_0 = arith.constant 0 : i32
    return %arg0, %c0_i32, %arg1 : i32, i32, i32
  }
}

</mosaic_0001>

<bundles_post_ra>
// kernel: tpu_custom_call.1
= control target key start
LH: loop header
LB: loop body
LE: loop exit
PB: predicated region body
PF: predicated region fallthrough
CT: control target
= control target key end

     0   :  { %8 = vsyncpa [#allocation3], 0  ;;  %s951_s0 = inlined_call_operand.hbm [shape: f32[2,32,256], index: 0, kind: input, shape index: {}]   ;;  %s952_s1 = inlined_call_operand.vmem [shape: f32[32,1], index: 1, kind: input, shape index: {}]   ;;  %s953_s2 = inlined_call_operand.vmem [shape: f32[32,1], index: 2, kind: input, shape index: {}]   ;;  %s954_s3 = inlined_call_operand.hbm [shape: f32[2,32,256], index: 3, kind: output, shape index: {}]  }
   0x1   :  { %10 = vsyncpa [#allocation3 + $0x1], 0 }
   0x2   :  { %11 = vsyncpa [#allocation4], 0 }
   0x3   :  { %13 = vsyncpa [#allocation4 + $0x1], 0  ;;  %s718_s12 = smov 0   ;;  %s720_s13 = smov 0  }
   0x4   :  { %s722_s14 = smov 0   ;;  %s724_s15 = smov 0  }
   0x5   :  { %s726_s16 = smov 0   ;;  %s728_s17 = smov 0  }
   0x6 LB: > { %s488_s18 = sadd.s32 4294967295, %s691_s17   ;;  %s489_s19 = sadd.s32 4294967294, %s691_s17   ;;  %s691_s17 = sphi %s728_s17, %s19_s17   ;;  %s687_s16 = sphi %s726_s16, %s963_s16   ;;  %s683_s15 = sphi %s724_s15, %s962_s15   ;;  %s679_s14 = sphi %s722_s14, %s961_s14   ;;  %s675_s13 = sphi %s720_s13, %s960_s13   ;;  %s671_s12 = sphi %s718_s12, %s959_s12  }
   0x7   : > { %s31_s20 = sadd.s32 1, %s687_s16  ;;  %s40_s21 = sadd.s32 1, %s679_s14 }
   0x8   : > { %p33_p0 = scmp.ge.s32.totalorder %s31_s20, 2  ;;  %p47_p1 = scmp.ne.s32.totalorder %s679_s14, %s675_s13 }
   0x9   : > { %p48_p2 = scmp.eq.s32.totalorder %s691_s17, 0  ;;  %p53_p3 = scmp.ne.s32.totalorder %s675_s13, %s671_s12 }
   0xa   : > { %s965_s20 = smov (%p33_p0, %s31_s20), 0  ;;  %p54_p5 = scmp.eq.s32.totalorder %s488_s18, 0 }
   0xb   : > { %p759_p4 = por %p48_p2, %p47_p1  ;;  %s35_s23 = ssub.s32 %s687_s16, %s965_s20 }
   0xc   : > { %p121_p6 = scmp.eq.s32.totalorder %s488_s18, 1  ;;  %p38_p7 = scmp.eq.s32.totalorder %s35_s23, 0 }
   0xd   : > { %p765_p8 = por %p54_p5, %p53_p3  ;;  %p127_p10 = scmp.eq.s32.totalorder %s489_s19, 1 }
   0xe   : > { %p769_p9 = por %p121_p6, %p47_p1  ;;  %p491_p12 = scmp.ge.s32.totalorder %s691_s17, 2 }
   0xf   : > { %s774_s26 = scalar_select %p38_p7, %s679_s14, %s40_s21  }
  0x10   : > { %p776_p11 = por %p127_p10, %p53_p3  ;;  %p517_p13 = scmp.lt.s32.totalorder %s691_s17, 2 }
  0x11   : > { %s153_s28 = sand.u32 1, %s679_s14   ;;  %s503_s30 = sshll.u32 %s687_s16, 6 }
  0x12   : > { %s492_s29 = sshll.u32 %s153_s28, 6  ;;  %s164_s6 = scalar_lea.hbm %s951_s0, %s503_s30 }
  0x13   : > { %s157_s7 = scalar_lea.vmem [#allocation2], %s492_s29  ;;  %s165_s9 = sshll.u32 %s164_s6, 4  ;;  %s166_s9 = int_to_ptr.hbm [resolvable:$true] %s165_s9 }
  0x14   : > { %s167_s8 = sshll.u32 %s157_s7, 4  ;;  %p510_p0 = pnand %p517_p13, %p759_p4  ;;  %s168_s8 = int_to_ptr.vmem [resolvable:$true] %s167_s8 }
  0x15   : > { %p495_p1 = scmp.ge.s32.totalorder %s691_s17, 1  ;;  %s154_s10 = scalar_lea.sflag [#allocation3], %s153_s28 }
  0x16   : > { %s693_s11 = smov 256   ;;  %s694_s18 = smov 16  }
  0x17   : > { %512 = dma.hbm_to_vmem [thread:$0]  (!%p510_p0), %s166_s9, 1024, %s168_s8, %s154_s10, %s693_s11, %s693_s11, %s694_s18  }
  0x18   : > { %p175_p2 = scmp.lt.s32.totalorder %s691_s17, 3 }
  0x1a   : > { %p176_p3 = pnand %p495_p1, %p175_p2 }
  0x1b   : > { %s792_s19 = sand.u32 (!%p176_p3), 1, %s675_s13  }
  0x1c   : > { %179 = sbr.rel (%p176_p3) target bundleno = 176 (0xb0), region = 32  ;;  %s496_s21 = sshll.u32 (!%p176_p3), %s792_s19, 6 }
  0x1d   : > { %s182_s23 = scalar_lea.sflag (!%p176_p3), [#allocation3], %s792_s19  ;;  %s798_s22 = scalar_lea.vmem (!%p176_p3), [#allocation2], %s496_s21 }
  0x21   : > { %662 = dma.done.wait (%p765_p8), %s182_s23, 1024  }
  0x22   : > { %664 = vsyncadd (%p765_p8), %s182_s23, 4294966272  ;;  %v695_v0 = vmov 0   ;;  %v313_v1 = vld [vmem:[%s952_s1 + $0x10] sm:$0xff]  ;;  %v311_v2 = vld [vmem:[%s952_s1] sm:$0xff]  ;;  %s384_s6 = scalar_lea.sflag [#allocation4], %s792_s19  ;;  %s629_s11 = scalar_lea.hbm %s954_s3, 128 }
  0x23   : > { %573 = vset.pattern.permute.xlu1 %v695_v0  ;;  %572 = vset.pattern.permute.xlu0 %v695_v0  ;;  %v343_v3 = vld [vmem:[%s953_s2] sm:$0xff]  ;;  %v314_v4 = vld [vmem:[%s952_s1 + $0x18] sm:$0xff]  ;;  %v312_v5 = vld [vmem:[%s952_s1 + $0x8] sm:$0xff] }
  0x24   : > { %574 = vset.pattern.permute.xlu2 %v695_v0  ;;  %327 = vperm.xlu1 %573, %v313_v1   ;;  %v344_v6 = vld [vmem:[%s953_s2 + $0x8] sm:$0xff]  ;;  %v346_v7 = vld [vmem:[%s953_s2 + $0x18] sm:$0xff]  ;;  %v345_v8 = vld [vmem:[%s953_s2 + $0x10] sm:$0xff] }
  0x25   : > { %317 = vperm.xlu0 %572, %v311_v2   ;;  %349 = vperm.xlu2 %574, %v343_v3   ;;  %v829_v9 = vld [vmem:[%s798_s22] sm:$0xff]  ;;  %v832_v10 = vld [vmem:[%s798_s22 + $0x8] sm:$0xff]  ;;  %v835_v11 = vld [vmem:[%s798_s22 + $0x10] sm:$0xff] }
  0x26   : > { %v838_v12 = vld [vmem:[%s798_s22 + $0x18] sm:$0xff]  ;;  %v219_v13 = vadd.f32 %v835_v11, %v829_v9  ;;  %v237_v14 = vmul.f32 %v829_v9, %v829_v9  ;;  %v238_v15 = vmul.f32 %v832_v10, %v832_v10  ;;  %v239_v16 = vmul.f32 %v835_v11, %v835_v11  ;;  %v849_v17 = vld [vmem:[%s798_s22 + $0x20] sm:$0xff]  ;;  %v852_v18 = vld [vmem:[%s798_s22 + $0x28] sm:$0xff] }
  0x27   : > { %v228_v19 = vadd.f32 %v838_v12, %v832_v10  ;;  %v240_v20 = vmul.f32 %v838_v12, %v838_v12  ;;  %v241_v22 = vmul.f32 %v849_v17, %v849_v17  ;;  %v242_v23 = vmul.f32 %v852_v18, %v852_v18  ;;  %v864_v25 = vld [vmem:[%s798_s22 + $0x30] sm:$0xff]  ;;  %v867_v26 = vld [vmem:[%s798_s22 + $0x38] sm:$0xff]  ;;  %s894_s22 = scalar_lea.vmem [#allocation5], %s496_s21  ;;  %s504_s21 = sshll.u32 %s683_s15, 6 }
  0x28   : > { %v220_v21 = vadd.f32 %v219_v13, %v849_v17  ;;  %v245_v24 = vadd.f32 %v239_v16, %v237_v14  ;;  %v243_v30 = vmul.f32 %v864_v25, %v864_v25  ;;  %v244_v31 = vmul.f32 %v867_v26, %v867_v26  ;;  %s397_s5 = scalar_lea.hbm %s954_s3, %s504_s21  ;;  %s398_s15 = sshll.u32 %s894_s22, 4  ;;  %s399_s15 = int_to_ptr.vmem [resolvable:$true] %s398_s15 }
  0x29   : > { %v229_v27 = vadd.f32 %v228_v19, %v852_v18  ;;  %v254_v28 = vadd.f32 %v240_v20, %v238_v15  ;;  %s400_s24 = sshll.u32 %s397_s5, 4  ;;  %s401_s24 = int_to_ptr.hbm [resolvable:$true] %s400_s24 }
  0x2a   : > { %v221_v29 = vadd.f32 %v220_v21, %v864_v25  ;;  %v246_v32 = vadd.f32 %v245_v24, %v241_v22  ;;  %s623_s7 = sshra.s32 %s401_s24, 4  ;;  %s624_s7 = int_to_ptr.hbm [resolvable:$true] %s623_s7 }
  0x2b   : > { %v230_v33 = vadd.f32 %v229_v27, %v867_v26  ;;  %v255_v34 = vadd.f32 %v254_v28, %v242_v23  ;;  %s625_s8 = scalar_lea.hbm %s624_s7, 64  ;;  %p630_p7 = scmp.lt.s32.totalorder %s624_s7, %s954_s3 }
  0x2c   : > { %332 = vperm.xlu1 %573, %v314_v4   ;;  %v222_v35 = vrot.slane %v221_v29, 4  ;;  %v247_v36 = vadd.f32 %v246_v32, %v243_v30  ;;  %p626_p4 = scmp.ne.s32.totalorder %s624_s7, %s625_s8  ;;  %p631_p8 = scmp.lt.s32.totalorder %s629_s11, %s625_s8 }
  0x2d   : > { %322 = vperm.xlu0 %572, %v312_v5   ;;  %354 = vperm.xlu2 %574, %v344_v6   ;;  %v231_v37 = vrot.slane %v230_v33, 4  ;;  %v256_v38 = vadd.f32 %v255_v34, %v244_v31 }
  0x2e   : > { %v223_v39 = vadd.f32 %v222_v35, %v221_v29  ;;  %v248_v40 = vrot.slane %v247_v36, 4  ;;  %p627_p5 = pnand %p626_p4, %p769_p9  ;;  %p632_p10 = por %p631_p8, %p630_p7 }
  0x2f   : > { %v232_v41 = vadd.f32 %v231_v37, %v230_v33  ;;  %v257_v42 = vrot.slane %v256_v38, 4 }
  0x30   : > { %v224_v43 = vrot.slane %v223_v39, 2  ;;  %v249_v44 = vadd.f32 %v248_v40, %v247_v36  ;;  %p628_p6 = pneg %p627_p5 }
  0x31   : > { %v233_v45 = vrot.slane %v232_v41, 2  ;;  %v258_v46 = vadd.f32 %v257_v42, %v256_v38 }
  0x32   : > { %v225_v47 = vadd.f32 %v224_v43, %v223_v39  ;;  %v250_v48 = vrot.slane %v249_v44, 2  ;;  %p633_p13 = pnand %p632_p10, %p628_p6 }
  0x33   : > { %v234_v49 = vadd.f32 %v233_v45, %v232_v41  ;;  %v259_v50 = vrot.slane %v258_v46, 2 }
  0x34   : > { %364 = vperm.xlu1 %573, %v346_v7   ;;  %v226_v51 = vrot.slane %v225_v47, 1  ;;  %v251_v52 = vadd.f32 %v250_v48, %v249_v44 }
  0x35   : > { %359 = vperm.xlu0 %572, %v345_v8   ;;  %v235_v53 = vrot.slane %v234_v49, 1  ;;  %v260_v54 = vadd.f32 %v259_v50, %v258_v46 }
  0x36   : > { %v227_v55 = vadd.f32 %v226_v51, %v225_v47  ;;  %v252_v56 = vrot.slane %v251_v52, 1 }
  0x37   : > { %v236_v57 = vadd.f32 %v235_v53, %v234_v49  ;;  %v261_v58 = vrot.slane %v260_v54, 1 }
  0x38   : > { %v253_v59 = vadd.f32 %v252_v56, %v251_v52  ;;  %v876_v60 = vmul.f32 0.03125, %v227_v55 }
  0x39   : > { %v262_v61 = vadd.f32 %v261_v58, %v260_v54  ;;  %v878_v62 = vmul.f32 0.03125, %v236_v57 }
  0x3a   : > { %v265_v63 = vmul.f32 0.03125, %v253_v59  ;;  %v267_v0 = vmul.f32 %v876_v60, %v876_v60  ;;  %v295_v29 = vsub.f32 %v829_v9, %v876_v60  ;;  %v297_v40 = vsub.f32 %v835_v11, %v876_v60 }
  0x3b   : > { %v266_v1 = vmul.f32 0.03125, %v262_v61  ;;  %v268_v2 = vmul.f32 %v878_v62, %v878_v62  ;;  %v296_v30 = vsub.f32 %v832_v10, %v878_v62  ;;  %v298_v41 = vsub.f32 %v838_v12, %v878_v62 }
  0x3c   : > { %v269_v3 = vsub.f32 %v265_v63, %v267_v0  ;;  %v299_v44 = vsub.f32 %v849_v17, %v876_v60  ;;  %v301_v11 = vsub.f32 %v864_v25, %v876_v60  ;;  %v302_v12 = vsub.f32 %v867_v26, %v878_v62 }
  0x3d   : > { %v270_v4 = vsub.f32 %v266_v1, %v268_v2  ;;  %v300_v45 = vsub.f32 %v852_v18, %v878_v62 }
  0x3e   : > { %v271_v5 = vmax.f32 %v269_v3, 0.0 }
  0x3f   : > { %v272_v6 = vmax.f32 %v270_v4, 0.0 }
  0x40   : > { %v273_v7 = vadd.f32 1e-06, %v271_v5 }
  0x41   : > { %v274_v8 = vadd.f32 1e-06, %v272_v6 }
  0x42   : > { %575 = vrsqrt.f32 %v273_v7  ;;  %vm281_vm0 = vweird.f32 %v273_v7 }
  0x43   : > { %577 = vrsqrt.f32 %v274_v8  ;;  %vm291_vm2 = vweird.f32 %v274_v8 }
  0x48   : > { %v576_v13 = vpop.eup %575 }
  0x49   : > { %v578_v14 = vpop.eup %577  ;;  %v276_v15 = vmul.f32 %v576_v13, %v273_v7  ;;  %vm282_vm1 = vweird.f32 %v576_v13 }
  0x4a   : > { %v286_v16 = vmul.f32 %v578_v14, %v274_v8  ;;  %vm292_vm3 = vweird.f32 %v578_v14  ;;  %vm283_vm4 = vmor %vm281_vm0, %vm282_vm1 }
  0x4b   : > { %v277_v19 = vmul.f32 %v576_v13, %v276_v15  ;;  %vm293_vm5 = vmor %vm291_vm2, %vm292_vm3 }
  0x4c   : > { %v287_v20 = vmul.f32 %v578_v14, %v286_v16 }
  0x4d   : > { %v278_v21 = vmul.f32 0.5, %v277_v19 }
  0x4e   : > { %v288_v22 = vmul.f32 0.5, %v287_v20 }
  0x4f   : > { %v279_v23 = vsub.f32 1.5, %v278_v21 }
  0x50   : > { %v289_v24 = vsub.f32 1.5, %v288_v22 }
  0x51   : > { %v280_v27 = vmul.f32 %v576_v13, %v279_v23 }
  0x52   : > { %v290_v28 = vmul.f32 %v578_v14, %v289_v24 }
  0x53   : > { %v284_v31 = vsel %vm283_vm4, %v576_v13, %v280_v27 }
  0x54   : > { %v294_v32 = vsel %vm293_vm5, %v578_v14, %v290_v28  ;;  %v303_v33 = vmul.f32 %v295_v29, %v284_v31  ;;  %v305_v10 = vmul.f32 %v297_v40, %v284_v31  ;;  %v307_v50 = vmul.f32 %v299_v44, %v284_v31 }
  0x55   : > { %v304_v34 = vmul.f32 %v296_v30, %v294_v32  ;;  %v306_v43 = vmul.f32 %v298_v41, %v294_v32  ;;  %v309_v17 = vmul.f32 %v301_v11, %v284_v31  ;;  %v310_v52 = vmul.f32 %v302_v12, %v294_v32 }
  0x56   : > { %v308_v25 = vmul.f32 %v300_v45, %v294_v32 }
  0x7f   : > { %v350_v35 = vpop.permute.xlu2 %349 }
  0x87   : > { %v355_v51 = vpop.permute.xlu2 %354 }
  0x96   : > { %v328_v36 = vpop.permute.xlu1 %327 }
  0x97   : > { %v318_v37 = vpop.permute.xlu0 %317  ;;  %v339_v18 = vmul.f32 %v328_v36, %v307_v50  ;;  %v340_v56 = vmul.f32 %v328_v36, %v308_v25 }
  0x98   : > { %v335_v38 = vmul.f32 %v318_v37, %v303_v33  ;;  %v336_v39 = vmul.f32 %v318_v37, %v304_v34 }
  0x9a   : > { %v367_v42 = vadd.f32 %v350_v35, %v335_v38  ;;  %v368_v9 = vadd.f32 %v350_v35, %v336_v39 }
  0x9c   : > { %375 = vst [vmem:[%s894_s22] sm:$0xff] %v367_v42 }
  0x9d   : > { %376 = vst [vmem:[%s894_s22 + $0x8] sm:$0xff] %v368_v9 }
  0x9e   : > { %v333_v46 = vpop.permute.xlu1 %332 }
  0x9f   : > { %v323_v47 = vpop.permute.xlu0 %322  ;;  %v341_v26 = vmul.f32 %v333_v46, %v309_v17  ;;  %v342_v55 = vmul.f32 %v333_v46, %v310_v52 }
  0xa0   : > { %v337_v48 = vmul.f32 %v323_v47, %v305_v10  ;;  %v338_v49 = vmul.f32 %v323_v47, %v306_v43 }
  0xa2   : > { %v369_v53 = vadd.f32 %v355_v51, %v337_v48  ;;  %v370_v54 = vadd.f32 %v355_v51, %v338_v49 }
  0xa4   : > { %377 = vst [vmem:[%s894_s22 + $0x10] sm:$0xff] %v369_v53 }
  0xa5   : > { %378 = vst [vmem:[%s894_s22 + $0x18] sm:$0xff] %v370_v54 }
  0xa6   : > { %v365_v57 = vpop.permute.xlu1 %364 }
  0xa7   : > { %v360_v58 = vpop.permute.xlu0 %359  ;;  %v373_v59 = vadd.f32 %v365_v57, %v341_v26  ;;  %v374_v60 = vadd.f32 %v365_v57, %v342_v55 }
  0xa8   : > { %v371_v61 = vadd.f32 %v360_v58, %v339_v18  ;;  %v372_v62 = vadd.f32 %v360_v58, %v340_v56 }
  0xa9   : > { %381 = vst [vmem:[%s894_s22 + $0x30] sm:$0xff] %v373_v59 }
  0xaa   : > { %382 = vst [vmem:[%s894_s22 + $0x38] sm:$0xff] %v374_v60 }
  0xab   : > { %379 = vst [vmem:[%s894_s22 + $0x20] sm:$0xff] %v371_v61 }
  0xac   : > { %380 = vst [vmem:[%s894_s22 + $0x28] sm:$0xff] %v372_v62 }
  0xad   : > { %636 = shalt.err (!%p633_p13)
}
  0xae   : > { %s696_s19 = smov 256   ;;  %s697_s28 = smov 16  }
  0xaf   : > { %507 = dma.vmem_to_hbm [thread:$0]  (%p769_p9), %s399_s15, 1024, %s401_s24, %s384_s6, %s696_s19, %s696_s19, %s697_s28  }
  0xb0 PF: > { %s415_s29 = sand.u32 1, %s671_s12   ;;  %p514_p0 = pnand %p491_p12, %p776_p11 }
  0xb1   : > { %s416_s22 = scalar_lea.sflag [#allocation4], %s415_s29 }
  0xb2   : > { %p515_p1 = pneg %p514_p0 }
  0xb4   : > { %666 = dma.done.wait (%p515_p1), %s416_s22, 1024  }
  0xb5   : > { %668 = vsyncadd (%p515_p1), %s416_s22, 4294966272  ;;  %s19_s17 = sadd.s32 1, %s691_s17   ;;  %s959_s12 = smov %s675_s13 }
  0xb6   : > { %p16_p2 = scmp.ge.s32.totalorder %s19_s17, 4   ;;  %s960_s13 = smov %s679_s14 }
  0xb7   : > { %s961_s14 = smov %s774_s26  ;;  %s962_s15 = smov %s687_s16 }
  0xb8   : > { %s963_s16 = smov %s965_s20  ;;  %18 = sbr.rel (!%p16_p2) target bundleno = 6 (0x6), region = 77 }
  0xbd   :  { %422 = vsyncpa [#allocation3], 1 }
  0xbe   :  { %424 = vsyncpa [#allocation3 + $0x1], 1 }
  0xbf   :  { %425 = vsyncpa [#allocation4], 1 }
  0xc0   :  { %427 = vsyncpa [#allocation4 + $0x1], 1 }

</bundles_post_ra>
